<compile_context>
chip_gen: v6e
topology: v6e:2x2x1
jax: 0.10.0
libtpu: 0.0.40
codegen_flags: <defaults>
</compile_context>

<pallas_src>
import jax
import jax.numpy as jnp
from jax.experimental import pallas as pl
from jax.experimental.pallas import tpu as pltpu

EPS = 1e-5


def _round_up(x, m):
    return (x + m - 1) // m * m


def _make_kernel(din_pad, dlab_pad, inv_b):
    def _bn_relu(h, gamma, beta):
        # Batch-axis reductions on the MXU (f32, HIGHEST precision), centered
        # two-pass variance (training-mode biased variance, eps=1e-5).
        ones = jnp.ones((1, h.shape[0]), jnp.float32)
        m = jnp.dot(ones, h, precision=jax.lax.Precision.HIGHEST,
                    preferred_element_type=jnp.float32) * inv_b
        d = h - m
        v = jnp.dot(ones, d * d, precision=jax.lax.Precision.HIGHEST,
                    preferred_element_type=jnp.float32) * inv_b
        scale = gamma * jax.lax.rsqrt(v + EPS)
        return jnp.maximum(d * scale + beta, 0.0)

    def encoder_kernel(x_ref, lab_ref, w1_ref, w2_ref, wh_ref, bnp_ref, bh_ref,
                       out_ref):
        x = x_ref[...]                       # (B, din_pad)  bf16
        lab = lab_ref[...]                   # (B, dlab_pad) bf16
        bnp = bnp_ref[...]                   # (4, Hp) f32: g1, be1, g2, be2

        # layer 1: Linear (bias folded away by training-mode BN) -> BN -> ReLU.
        # w1 row blocks are packed at bf16-tile-aligned offsets (multiples of 16).
        h = (jnp.dot(x, w1_ref[0:din_pad, :],
                     preferred_element_type=jnp.float32)
             + jnp.dot(lab, w1_ref[din_pad:din_pad + dlab_pad, :],
                       preferred_element_type=jnp.float32))
        h = _bn_relu(h, bnp[0:1, :], bnp[1:2, :])

        # layer 2: Linear (bias folded) -> BN -> ReLU (bf16 MXU, f32 accumulate).
        h = jnp.dot(h.astype(jnp.bfloat16), w2_ref[...],
                    preferred_element_type=jnp.float32)
        h = _bn_relu(h, bnp[2:3, :], bnp[3:4, :])

        # fused mu/std heads: single bf16 matmul, single lane-dense (B, 128k) store.
        out_ref[...] = (jnp.dot(h.astype(jnp.bfloat16), wh_ref[...],
                                preferred_element_type=jnp.float32)
                        + bh_ref[...])

    return encoder_kernel


def pack_params(params, input_dim, label_dim, hidden_dim, latent_dim):
    """One-time packing/padding of parameters into kernel layout (bf16 weights)."""
    din_pad = _round_up(input_dim, 16)     # bf16 sublane tile = 16 rows
    dlab_pad = _round_up(label_dim, 16)
    hp = _round_up(hidden_dim, 128)
    lout_pad = max(128, _round_up(2 * latent_dim, 128))

    w1p = jnp.zeros((din_pad + dlab_pad, hp), jnp.float32)
    w1p = w1p.at[:input_dim, :hidden_dim].set(params["w1"][:input_dim])
    w1p = w1p.at[din_pad:din_pad + label_dim, :hidden_dim].set(
        params["w1"][input_dim:])

    w2p = jnp.zeros((hp, hp), jnp.float32)
    w2p = w2p.at[:hidden_dim, :hidden_dim].set(params["w2"])

    whp = jnp.zeros((hp, lout_pad), jnp.float32)
    whp = whp.at[:hidden_dim, :latent_dim].set(params["wmu"])
    whp = whp.at[:hidden_dim, latent_dim:2 * latent_dim].set(params["wstd"])

    bhp = jnp.zeros((1, lout_pad), jnp.float32)
    bhp = bhp.at[:, :latent_dim].set(params["bmu"][0])
    bhp = bhp.at[:, latent_dim:2 * latent_dim].set(params["bstd"][0])

    # gamma/beta packed as one (4, Hp) slab; padded columns get gamma=beta=0 so
    # padded features stay exactly zero through BN/ReLU.
    bnp = jnp.zeros((4, hp), jnp.float32)
    bnp = bnp.at[0, :hidden_dim].set(params["g1"][0])
    bnp = bnp.at[1, :hidden_dim].set(params["be1"][0])
    bnp = bnp.at[2, :hidden_dim].set(params["g2"][0])
    bnp = bnp.at[3, :hidden_dim].set(params["be2"][0])

    return dict(
        w1=w1p.astype(jnp.bfloat16),
        w2=w2p.astype(jnp.bfloat16),
        wh=whp.astype(jnp.bfloat16),
        bn=bnp,
        bh=bhp,
        dims=(input_dim, label_dim, din_pad, dlab_pad,
              hidden_dim, hp, latent_dim, lout_pad),
    )


def encoder_forward(x, label, packed):
    """x: (B, input_dim), label: (B, label_dim) -> (mu, std), each (B, latent_dim)."""
    (din, dlab, din_pad, dlab_pad, hidden, hp, latent, lout_pad) = packed["dims"]
    B = x.shape[0]  # NOTE: batch must be the real batch (no padding) for BN stats.

    # Pad activations to the packed w1 row blocks (no-ops when already aligned)
    # and cast to bf16 so the matmul DMAs/VMEM are half width.
    xp = jnp.pad(x, ((0, 0), (0, din_pad - din))).astype(jnp.bfloat16)
    labp = jnp.pad(label, ((0, 0), (0, dlab_pad - dlab))).astype(jnp.bfloat16)

    kernel = _make_kernel(din_pad, dlab_pad, 1.0 / B)
    vmem = pl.BlockSpec(memory_space=pltpu.MemorySpace.VMEM)

    flops = (2 * B * (din_pad + dlab_pad) * hp    # layer 1
             + 2 * B * hp * hp                    # layer 2
             + 2 * B * hp * lout_pad              # fused head
             + 8 * B * hp)                        # BN stats dots (2 layers x 2)
    bytes_accessed = (B * din_pad * 2 + B * dlab_pad * 2
                      + (din_pad + dlab_pad) * hp * 2 + hp * hp * 2
                      + hp * lout_pad * 2 + 4 * hp * 4 + lout_pad * 4
                      + B * lout_pad * 4)

    out = pl.pallas_call(
        kernel,
        out_shape=jax.ShapeDtypeStruct((B, lout_pad), jnp.float32),
        in_specs=[vmem] * 7,
        out_specs=vmem,
        compiler_params=pltpu.CompilerParams(
            vmem_limit_bytes=32 * 1024 * 1024),
        cost_estimate=pl.CostEstimate(
            flops=flops, transcendentals=2 * hp,
            bytes_accessed=bytes_accessed),
    )(xp, labp, packed["w1"], packed["w2"], packed["wh"],
      packed["bn"], packed["bh"])

    return out[:, :latent], out[:, latent:2 * latent]


def init_params(key, input_dim, label_dim, hidden_dim, latent_dim):
    """Deterministic synthetic init mirroring PyTorch Linear's U(-1/sqrt(fan_in), ...)."""
    def linear(k, fan_in, fan_out):
        kw, kb = jax.random.split(k)
        bound = 1.0 / jnp.sqrt(fan_in)
        w = jax.random.uniform(kw, (fan_in, fan_out), jnp.float32, -bound, bound)
        b = jax.random.uniform(kb, (1, fan_out), jnp.float32, -bound, bound)
        return w, b

    k1, k2, k3, k4 = jax.random.split(key, 4)
    w1, b1 = linear(k1, input_dim + label_dim, hidden_dim)
    w2, b2 = linear(k2, hidden_dim, hidden_dim)
    wmu, bmu = linear(k3, hidden_dim, latent_dim)
    wstd, bstd = linear(k4, hidden_dim, latent_dim)
    return dict(
        w1=w1, b1=b1,
        g1=jnp.ones((1, hidden_dim), jnp.float32),
        be1=jnp.zeros((1, hidden_dim), jnp.float32),
        w2=w2, b2=b2,
        g2=jnp.ones((1, hidden_dim), jnp.float32),
        be2=jnp.zeros((1, hidden_dim), jnp.float32),
        wmu=wmu, bmu=bmu, wstd=wstd, bstd=bstd,
    )


def encoder_reference_f32(x, label, params):
    """Pure-f32 JAX reference mirroring the PyTorch module exactly (incl. b1/b2)."""
    def bn_relu(h, g, be):
        m = jnp.mean(h, axis=0, keepdims=True)
        v = jnp.mean((h - m) ** 2, axis=0, keepdims=True)
        return jnp.maximum((h - m) * jax.lax.rsqrt(v + EPS) * g + be, 0.0)

    xl = jnp.concatenate([x, label], axis=-1)
    h = bn_relu(xl @ params["w1"] + params["b1"], params["g1"], params["be1"])
    h = bn_relu(h @ params["w2"] + params["b2"], params["g2"], params["be2"])
    return h @ params["wmu"] + params["bmu"], h @ params["wstd"] + params["bstd"]


def encoder_reference_mixed(x, label, params):
    """Reference with the same bf16-matmul / f32-elementwise numerics as the kernel."""
    bf = jnp.bfloat16

    def mm(a, w):
        return jnp.dot(a.astype(bf), w.astype(bf),
                       preferred_element_type=jnp.float32)

    def bn_relu(h, g, be):
        m = jnp.mean(h, axis=0, keepdims=True)
        v = jnp.mean((h - m) ** 2, axis=0, keepdims=True)
        return jnp.maximum((h - m) * jax.lax.rsqrt(v + EPS) * g + be, 0.0)

    din = x.shape[1]
    h = bn_relu(mm(x, params["w1"][:din]) + mm(label, params["w1"][din:]),
                params["g1"], params["be1"])
    h = bn_relu(mm(h, params["w2"]), params["g2"], params["be2"])
    return (mm(h, params["wmu"]) + params["bmu"],
            mm(h, params["wstd"]) + params["bstd"])


if __name__ == "__main__":
    B, input_dim, label_dim, hidden_dim, latent_dim = 8, 16, 8, 32, 8

    key = jax.random.PRNGKey(0)
    kx, kl, kp = jax.random.split(key, 3)
    x = jax.random.normal(kx, (B, input_dim), jnp.float32)
    label = jax.random.normal(kl, (B, label_dim), jnp.float32)
    params = init_params(kp, input_dim, label_dim, hidden_dim, latent_dim)

    packed = pack_params(params, input_dim, label_dim, hidden_dim, latent_dim)

    mu, std = encoder_forward(x, label, packed)
    jax.block_until_ready((mu, std))

    # Tight check against a reference with matching mixed-precision numerics.
    mu_m, std_m = encoder_reference_mixed(x, label, params)
    assert jnp.allclose(mu, mu_m, atol=2e-2, rtol=2e-2)
    assert jnp.allclose(std, std_m, atol=2e-2, rtol=2e-2)

    # Loose check against the full-f32 PyTorch-faithful reference (bf16 MXU inputs
    # shift numerics by O(1e-2)).
    mu_r, std_r = encoder_reference_f32(x, label, params)
    assert jnp.allclose(mu, mu_r, atol=1e-1, rtol=1e-1)
    assert jnp.allclose(std, std_r, atol=1e-1, rtol=1e-1)

    print("KERNEL_OK")
</pallas_src>

<mosaic_0001>
module attributes {stable_mosaic.version = 11 : i64} {
  func.func @encoder_kernel(%arg0: memref<8x16xbf16, #tpu.memory_space<vmem>>, %arg1: memref<8x16xbf16, #tpu.memory_space<vmem>>, %arg2: memref<32x128xbf16, #tpu.memory_space<vmem>>, %arg3: memref<128x128xbf16, #tpu.memory_space<vmem>>, %arg4: memref<128x128xbf16, #tpu.memory_space<vmem>>, %arg5: memref<4x128xf32, #tpu.memory_space<vmem>>, %arg6: memref<1x128xf32, #tpu.memory_space<vmem>>, %arg7: memref<8x128xf32, #tpu.memory_space<vmem>>) attributes {dimension_semantics = [], scalar_prefetch = 0 : i64, scratch_operands = 0 : i64, tpu.core_type = #tpu.core_type<tc>} {
    %c0 = arith.constant 0 : index
    %c0_0 = arith.constant 0 : index
    %0 = vector.load %arg0[%c0, %c0_0] : memref<8x16xbf16, #tpu.memory_space<vmem>>, vector<8x16xbf16>
    %c0_1 = arith.constant 0 : index
    %c0_2 = arith.constant 0 : index
    %1 = vector.load %arg1[%c0_1, %c0_2] : memref<8x16xbf16, #tpu.memory_space<vmem>>, vector<8x16xbf16>
    %c0_3 = arith.constant 0 : index
    %c0_4 = arith.constant 0 : index
    %2 = vector.load %arg5[%c0_3, %c0_4] : memref<4x128xf32, #tpu.memory_space<vmem>>, vector<4x128xf32>
    %c0_5 = arith.constant 0 : index
    %c0_6 = arith.constant 0 : index
    %3 = vector.load %arg2[%c0_5, %c0_6] : memref<32x128xbf16, #tpu.memory_space<vmem>>, vector<16x128xbf16>
    %cst = arith.constant dense<0.000000e+00> : vector<8x128xf32>
    %4 = tpu.matmul %0, %3, %cst {dimension_numbers = #tpu.dot_dimension_numbers<[1], [0], [0], [1], [0, 0, 1, 1], [], []>} : vector<8x16xbf16>, vector<16x128xbf16>, vector<8x128xf32> -> vector<8x128xf32>
    %c16 = arith.constant 16 : index
    %c0_7 = arith.constant 0 : index
    %5 = vector.load %arg2[%c16, %c0_7] : memref<32x128xbf16, #tpu.memory_space<vmem>>, vector<16x128xbf16>
    %cst_8 = arith.constant dense<0.000000e+00> : vector<8x128xf32>
    %6 = tpu.matmul %1, %5, %cst_8 {dimension_numbers = #tpu.dot_dimension_numbers<[1], [0], [0], [1], [0, 0, 1, 1], [], []>} : vector<8x16xbf16>, vector<16x128xbf16>, vector<8x128xf32> -> vector<8x128xf32>
    %7 = arith.addf %4, %6 : vector<8x128xf32>
    %8 = vector.extract_strided_slice %2 {offsets = [0, 0], sizes = [1, 128], strides = [1, 1]} : vector<4x128xf32> to vector<1x128xf32>
    %9 = vector.extract_strided_slice %2 {offsets = [1, 0], sizes = [1, 128], strides = [1, 1]} : vector<4x128xf32> to vector<1x128xf32>
    %cst_9 = arith.constant 1.000000e+00 : f32
    %10 = vector.broadcast %cst_9 : f32 to vector<1x8xf32>
    %cst_10 = arith.constant dense<0.000000e+00> : vector<1x128xf32>
    %11 = tpu.matmul %10, %7, %cst_10 {dimension_numbers = #tpu.dot_dimension_numbers<[1], [0], [0], [1], [0, 0, 1, 1], [], []>, precision = #tpu.contract_precision<fp32>} : vector<1x8xf32>, vector<8x128xf32>, vector<1x128xf32> -> vector<1x128xf32>
    %cst_11 = arith.constant 1.250000e-01 : f32
    %12 = vector.broadcast %cst_11 : f32 to vector<1x128xf32>
    %13 = arith.mulf %11, %12 : vector<1x128xf32>
    %14 = vector.broadcast %13 : vector<1x128xf32> to vector<8x128xf32>
    %15 = arith.subf %7, %14 : vector<8x128xf32>
    %16 = arith.mulf %15, %15 : vector<8x128xf32>
    %cst_12 = arith.constant dense<0.000000e+00> : vector<1x128xf32>
    %17 = tpu.matmul %10, %16, %cst_12 {dimension_numbers = #tpu.dot_dimension_numbers<[1], [0], [0], [1], [0, 0, 1, 1], [], []>, precision = #tpu.contract_precision<fp32>} : vector<1x8xf32>, vector<8x128xf32>, vector<1x128xf32> -> vector<1x128xf32>
    %cst_13 = arith.constant 1.250000e-01 : f32
    %18 = vector.broadcast %cst_13 : f32 to vector<1x128xf32>
    %19 = arith.mulf %17, %18 : vector<1x128xf32>
    %cst_14 = arith.constant 9.99999974E-6 : f32
    %20 = vector.broadcast %cst_14 : f32 to vector<1x128xf32>
    %21 = arith.addf %19, %20 : vector<1x128xf32>
    %22 = math.rsqrt %21 : vector<1x128xf32>
    %23 = arith.mulf %8, %22 : vector<1x128xf32>
    %24 = vector.broadcast %23 : vector<1x128xf32> to vector<8x128xf32>
    %25 = arith.mulf %15, %24 : vector<8x128xf32>
    %26 = vector.broadcast %9 : vector<1x128xf32> to vector<8x128xf32>
    %27 = arith.addf %25, %26 : vector<8x128xf32>
    %cst_15 = arith.constant 0.000000e+00 : f32
    %28 = vector.broadcast %cst_15 : f32 to vector<8x128xf32>
    %29 = arith.maximumf %27, %28 : vector<8x128xf32>
    %30 = arith.truncf %29 : vector<8x128xf32> to vector<8x128xbf16>
    %c0_16 = arith.constant 0 : index
    %c0_17 = arith.constant 0 : index
    %31 = vector.load %arg3[%c0_16, %c0_17] : memref<128x128xbf16, #tpu.memory_space<vmem>>, vector<128x128xbf16>
    %cst_18 = arith.constant dense<0.000000e+00> : vector<8x128xf32>
    %32 = tpu.matmul %30, %31, %cst_18 {dimension_numbers = #tpu.dot_dimension_numbers<[1], [0], [0], [1], [0, 0, 1, 1], [], []>} : vector<8x128xbf16>, vector<128x128xbf16>, vector<8x128xf32> -> vector<8x128xf32>
    %33 = vector.extract_strided_slice %2 {offsets = [2, 0], sizes = [1, 128], strides = [1, 1]} : vector<4x128xf32> to vector<1x128xf32>
    %34 = vector.extract_strided_slice %2 {offsets = [3, 0], sizes = [1, 128], strides = [1, 1]} : vector<4x128xf32> to vector<1x128xf32>
    %cst_19 = arith.constant 1.000000e+00 : f32
    %35 = vector.broadcast %cst_19 : f32 to vector<1x8xf32>
    %cst_20 = arith.constant dense<0.000000e+00> : vector<1x128xf32>
    %36 = tpu.matmul %35, %32, %cst_20 {dimension_numbers = #tpu.dot_dimension_numbers<[1], [0], [0], [1], [0, 0, 1, 1], [], []>, precision = #tpu.contract_precision<fp32>} : vector<1x8xf32>, vector<8x128xf32>, vector<1x128xf32> -> vector<1x128xf32>
    %cst_21 = arith.constant 1.250000e-01 : f32
    %37 = vector.broadcast %cst_21 : f32 to vector<1x128xf32>
    %38 = arith.mulf %36, %37 : vector<1x128xf32>
    %39 = vector.broadcast %38 : vector<1x128xf32> to vector<8x128xf32>
    %40 = arith.subf %32, %39 : vector<8x128xf32>
    %41 = arith.mulf %40, %40 : vector<8x128xf32>
    %cst_22 = arith.constant dense<0.000000e+00> : vector<1x128xf32>
    %42 = tpu.matmul %35, %41, %cst_22 {dimension_numbers = #tpu.dot_dimension_numbers<[1], [0], [0], [1], [0, 0, 1, 1], [], []>, precision = #tpu.contract_precision<fp32>} : vector<1x8xf32>, vector<8x128xf32>, vector<1x128xf32> -> vector<1x128xf32>
    %cst_23 = arith.constant 1.250000e-01 : f32
    %43 = vector.broadcast %cst_23 : f32 to vector<1x128xf32>
    %44 = arith.mulf %42, %43 : vector<1x128xf32>
    %cst_24 = arith.constant 9.99999974E-6 : f32
    %45 = vector.broadcast %cst_24 : f32 to vector<1x128xf32>
    %46 = arith.addf %44, %45 : vector<1x128xf32>
    %47 = math.rsqrt %46 : vector<1x128xf32>
    %48 = arith.mulf %33, %47 : vector<1x128xf32>
    %49 = vector.broadcast %48 : vector<1x128xf32> to vector<8x128xf32>
    %50 = arith.mulf %40, %49 : vector<8x128xf32>
    %51 = vector.broadcast %34 : vector<1x128xf32> to vector<8x128xf32>
    %52 = arith.addf %50, %51 : vector<8x128xf32>
    %cst_25 = arith.constant 0.000000e+00 : f32
    %53 = vector.broadcast %cst_25 : f32 to vector<8x128xf32>
    %54 = arith.maximumf %52, %53 : vector<8x128xf32>
    %55 = arith.truncf %54 : vector<8x128xf32> to vector<8x128xbf16>
    %c0_26 = arith.constant 0 : index
    %c0_27 = arith.constant 0 : index
    %56 = vector.load %arg4[%c0_26, %c0_27] : memref<128x128xbf16, #tpu.memory_space<vmem>>, vector<128x128xbf16>
    %cst_28 = arith.constant dense<0.000000e+00> : vector<8x128xf32>
    %57 = tpu.matmul %55, %56, %cst_28 {dimension_numbers = #tpu.dot_dimension_numbers<[1], [0], [0], [1], [0, 0, 1, 1], [], []>} : vector<8x128xbf16>, vector<128x128xbf16>, vector<8x128xf32> -> vector<8x128xf32>
    %c0_29 = arith.constant 0 : index
    %c0_30 = arith.constant 0 : index
    %58 = vector.load %arg6[%c0_29, %c0_30] : memref<1x128xf32, #tpu.memory_space<vmem>>, vector<1x128xf32>
    %59 = vector.broadcast %58 : vector<1x128xf32> to vector<8x128xf32>
    %60 = arith.addf %57, %59 : vector<8x128xf32>
    %c0_31 = arith.constant 0 : index
    %c0_32 = arith.constant 0 : index
    %61 = vector.load %arg7[%c0_31, %c0_32] : memref<8x128xf32, #tpu.memory_space<vmem>>, vector<8x128xf32>
    tpu.vector_store %arg7[%c0_31, %c0_32], %60 {strides = array<i32>} : memref<8x128xf32, #tpu.memory_space<vmem>>, vector<8x128xf32>,
    return
  }
}

</mosaic_0001>

<bundles_post_ra>
// kernel: tpu_custom_call.1
= control target key start
LH: loop header
LB: loop body
LE: loop exit
PB: predicated region body
PF: predicated region fallthrough
CT: control target
= control target key end

     0   :  { %12 = vsyncpa [#allocation3], 0  ;;  %s2961_s0 = inlined_call_operand.hbm [shape: bf16[8,16], index: 0, kind: input, shape index: {}]   ;;  %s2962_s1 = inlined_call_operand.hbm [shape: bf16[8,16], index: 1, kind: input, shape index: {}]   ;;  %s2963_s2 = inlined_call_operand.hbm [shape: bf16[32,128], index: 2, kind: input, shape index: {}]   ;;  %s2964_s3 = inlined_call_operand.hbm [shape: bf16[128,128], index: 3, kind: input, shape index: {}]   ;;  %s2965_s4 = inlined_call_operand.hbm [shape: bf16[128,128], index: 4, kind: input, shape index: {}]   ;;  %s2966_s5 = inlined_call_operand.vmem [shape: f32[4,128], index: 5, kind: input, shape index: {}]   ;;  %s2967_s6 = inlined_call_operand.vmem [shape: f32[1,128], index: 6, kind: input, shape index: {}]   ;;  %s2968_s7 = inlined_call_operand.hbm [shape: f32[8,128], index: 7, kind: output, shape index: {}]  }
   0x1   :  { %13 = vsyncpa [#allocation6], 0 }
   0x2   :  { %14 = vsyncpa [#allocation9], 0 }
   0x3   :  { %15 = vsyncpa [#allocation4], 0  ;;  %s2705_s24 = smov [#allocation5]  }
   0x4   :  { %s32_s25 = sshll.u32 %s2705_s24, 4  ;;  %s33_s25 = int_to_ptr.vmem [resolvable:$true] %s32_s25 }
   0x5   :  { %s2585_s26 = scalar_lea.vmem %s33_s25, 64  ;;  %p2590_p1 = scmp.lt.s32.totalorder %s33_s25, %s33_s25 }
   0x6   :  { %p2586_p0 = scmp.ne.s32.totalorder %s33_s25, %s2585_s26  ;;  %p2591_p2 = scmp.lt.s32.totalorder %s2585_s26, %s2585_s26 }
   0x8   :  { %p2592_p3 = por %p2591_p2, %p2590_p1 }
   0xa   :  { %p2593_p4 = pnand %p2592_p3, %p2586_p0 }
   0xc   :  { %2596 = shalt.err (!%p2593_p4)
}
   0xd   :  { %35 = dma.hbm_to_vmem [thread:$0]  %s2962_s1, 64, %s33_s25, [#allocation6]  }
   0xe   :  { %s2706_s29 = smov [#allocation8]   ;;  %s2707_s8 = smov [#allocation2]  }
   0xf   :  { %s53_s30 = sshll.u32 %s2706_s29, 4  ;;  %s22_s9 = sshll.u32 %s2707_s8, 4  ;;  %s54_s30 = int_to_ptr.vmem [resolvable:$true] %s53_s30  ;;  %s23_s9 = int_to_ptr.vmem [resolvable:$true] %s22_s9 }
  0x10   :  { %s2605_s10 = scalar_lea.vmem %s54_s30, 1024  ;;  %p2610_p6 = scmp.lt.s32.totalorder %s54_s30, %s54_s30 }
  0x11   :  { %p2606_p5 = scmp.ne.s32.totalorder %s54_s30, %s2605_s10  ;;  %p2611_p7 = scmp.lt.s32.totalorder %s2605_s10, %s2605_s10 }
  0x13   :  { %p2612_p8 = por %p2611_p7, %p2610_p6 }
  0x15   :  { %p2613_p9 = pnand %p2612_p8, %p2606_p5 }
  0x17   :  { %2616 = shalt.err (!%p2613_p9)
}
  0x18   :  { %s2708_s11 = smov 64   ;;  %s2709_s12 = smov 4  }
  0x19   :  { %59 = dma.hbm_to_vmem [thread:$0]  %s2964_s3, 1024, %s54_s30, [#allocation9], %s2708_s11, %s2708_s11, %s2709_s12  }
  0x1a   :  { %s2625_s1 = scalar_lea.vmem %s23_s9, 64  ;;  %p2630_p11 = scmp.lt.s32.totalorder %s23_s9, %s23_s9 }
  0x1b   :  { %p2626_p10 = scmp.ne.s32.totalorder %s23_s9, %s2625_s1  ;;  %p2631_p12 = scmp.lt.s32.totalorder %s2625_s1, %s2625_s1 }
  0x1d   :  { %p2632_p13 = por %p2631_p12, %p2630_p11 }
  0x1f   :  { %p2633_p0 = pnand %p2632_p13, %p2626_p10 }
  0x21   :  { %2636 = shalt.err (!%p2633_p0)
}
  0x22   :  { %25 = dma.hbm_to_vmem [thread:$0]  %s2961_s0, 64, %s23_s9, [#allocation3]  }
  0x23   :  { %s2710_s17 = smov [#allocation7]   ;;  %s2711_s19 = smov [#allocation10]  }
  0x24   :  { %s41_s18 = sshll.u32 %s2710_s17, 4  ;;  %s65_s20 = sshll.u32 %s2711_s19, 4  ;;  %s42_s18 = int_to_ptr.vmem [resolvable:$true] %s41_s18  ;;  %s66_s20 = int_to_ptr.vmem [resolvable:$true] %s65_s20 }
  0x25   :  { %s2645_s21 = scalar_lea.vmem %s42_s18, 256  ;;  %p2650_p2 = scmp.lt.s32.totalorder %s42_s18, %s42_s18 }
  0x26   :  { %p2646_p1 = scmp.ne.s32.totalorder %s42_s18, %s2645_s21  ;;  %p2651_p3 = scmp.lt.s32.totalorder %s2645_s21, %s2645_s21 }
  0x28   :  { %p2652_p4 = por %p2651_p3, %p2650_p2 }
  0x2a   :  { %p2653_p5 = pnand %p2652_p4, %p2646_p1 }
  0x2c   :  { %2656 = shalt.err (!%p2653_p5)
}
  0x2d   :  { %47 = dma.hbm_to_vmem [thread:$0]  %s2963_s2, 256, %s42_s18, [#allocation6], %s2708_s11, %s2708_s11, %s2709_s12  }
  0x2e   :  { %s2665_s0 = scalar_lea.vmem %s66_s20, 1024  ;;  %p2670_p7 = scmp.lt.s32.totalorder %s66_s20, %s66_s20 }
  0x2f   :  { %p2666_p6 = scmp.ne.s32.totalorder %s66_s20, %s2665_s0  ;;  %p2671_p8 = scmp.lt.s32.totalorder %s2665_s0, %s2665_s0 }
  0x31   :  { %p2672_p9 = por %p2671_p8, %p2670_p7 }
  0x33   :  { %p2673_p10 = pnand %p2672_p9, %p2666_p6 }
  0x35   :  { %2676 = shalt.err (!%p2673_p10)
}
  0x36   :  { %71 = dma.hbm_to_vmem [thread:$0]  %s2965_s4, 1024, %s66_s20, [#allocation9], %s2708_s11, %s2708_s11, %s2709_s12  }
  0x37   :  { %2697 = dma.done.wait [#allocation3], 64  }
  0x38   :  { %2698 = vsyncadd [#allocation3], 4294967232 }
  0x39   :  { %2699 = dma.done.wait [#allocation6], 320  }
  0x3a   :  { %2700 = vsyncadd [#allocation6], 4294966976 }
  0x3b   :  { %2701 = dma.done.wait [#allocation9], 2048  }
  0x3c   :  { %2702 = vsyncadd [#allocation9], 4294965248  ;;  %v2712_v0 = vmov 0.0   ;;  %vm2713_vm0 = vmmov 0   ;;  %v2555_v1 = vld [vmem:[#allocation7 + $0x8] sm:$0xff]   ;;  %vm105_vm1 = vcmask 130048   ;;  %v649_v35 = vlaneseq }
  0x3d   :  { %2371 = vmatprep.subr.bf16.mxu0 %v2712_v0  ;;  %2373 = vmatprep.mubr.msk.bf16.mxu0 %vm2713_vm0, %v2712_v0  ;;  %v93_v2 = vld [vmem:[#allocation5] sm:$0xf]  ;;  %v2556_v3 = vld [vmem:[#allocation7] sm:$0xff]   ;;  %v92_v4 = vld [vmem:[#allocation2] sm:$0xf]  ;;  %vm198_vm2 = vcmask 64512  }
  0x3e   :  { %2408 = vmatprep.subr.mxu1 %v2712_v0  ;;  %2410 = vmatprep.mubr.msk.f32.mxu1 %vm2713_vm0, %v2712_v0  ;;  %v2714_v5 = vmov 0   ;;  %v2715_v23 = vmov 1.0   ;;  %v2830_v40 = vshrl.u32 %v649_v35, 7  ;;  %v2557_v55 = vld [vmem:[#allocation8 + $0x38] sm:$0xff]   ;;  %v2558_v56 = vld [vmem:[#allocation8 + $0x30] sm:$0xff]   ;;  %v2559_v57 = vld [vmem:[#allocation8 + $0x28] sm:$0xff]  }
  0x3f   :  { %2372 = vmatpush3.bf16.msra.mxu0 %v2555_v1  ;;  %v200_v6 = vsel %vm198_vm2, 1.0, %v2714_v5  ;;  %v2560_v58 = vld [vmem:[#allocation8 + $0x20] sm:$0xff]   ;;  %v2561_v59 = vld [vmem:[#allocation8 + $0x18] sm:$0xff]   ;;  %v2562_v60 = vld [vmem:[#allocation8 + $0x10] sm:$0xff]   ;;  %s2716_s26 = smov [#allocation11]  }
  0x40   :  { %2377 = vmatprep.subr.bf16.mxu0 %v2712_v0  ;;  %v2794_v7 = vsub.f32 %v200_v6, %v200_v6  ;;  %v2833_v45 = vsub.s32 0, %v2830_v40  ;;  %v2563_v61 = vld [vmem:[#allocation8 + $0x8] sm:$0xff]   ;;  %v2564_v62 = vld [vmem:[#allocation8] sm:$0xff]   ;;  %s2257_s27 = sshll.u32 %s2716_s26, 4  ;;  %s2258_s27 = int_to_ptr.vmem [resolvable:$true] %s2257_s27 }
  0x41   :  { %s2677_s28 = scalar_lea.vmem %s2258_s27, 128  ;;  %p2682_p12 = scmp.lt.s32.totalorder %s2258_s27, %s2258_s27 }
  0x42   :  { %2374 = vmatmul.mubr.msk.bf16.vlgmr.msra.gmra.mxu0 %vm105_vm1, %v93_v2  ;;  %v2797_v10 = vand.u32 4294901760, %v2794_v7  ;;  %p2678_p11 = scmp.ne.s32.totalorder %s2258_s27, %s2677_s28  ;;  %p2683_p13 = scmp.lt.s32.totalorder %s2677_s28, %s2677_s28 }
  0x43   :  { %2378 = vmatpush3.bf16.msra.mxu0 %v2556_v3  ;;  %2379 = vmatprep.mubr.msk.bf16.mxu0 %vm2713_vm0, %v2712_v0 }
  0x44   :  { %2383 = vmatprep.subr.mxu0 %v2712_v0  ;;  %v271_v13 = vsub.f32 %v2794_v7, %v2797_v10  ;;  %p2684_p0 = por %p2683_p13, %p2682_p12 }
  0x46   :  { %v2801_v17 = vand.u32 4294901760, %v271_v13  ;;  %p2685_p1 = pnand %p2684_p0, %p2678_p11 }
  0x4a   :  { %2380 = vmatmul.mubr.msk.bf16.vlgmr.msra.gmra.mxu0 %vm105_vm1, %v92_v4 }
  0x4b   :  { %2385 = vmatprep.mubr.msk.f32.mxu0 %vm2713_vm0, %v2712_v0 }
 0x102   :  { %v143_v8 = vpop.f32.mrf.mxu0 }
 0x104   :  { %v2375_v9 = vpop.f32.mrf.mxu0 }
 0x106   :  { %v146_v11 = vpop.f32.mrf.mxu0 }
 0x108   :  { %v2376_v12 = vpop.f32.mrf.mxu0 }
 0x10a   :  { %v192_v14 = vpop.f32.mrf.mxu0 }
 0x10b   :  { %v193_v15 = vadd.f32 %v192_v14, %v143_v8 }
 0x10c   :  { %v2381_v16 = vpop.f32.mrf.mxu0 }
 0x10d   :  { %v233_v18 = vand.u32 4294901760, %v193_v15 }
 0x10e   :  { %v195_v19 = vpop.f32.mrf.mxu0 }
 0x10f   :  { %v310_v20 = vsub.f32 %v193_v15, %v233_v18  ;;  %2384 = vmatpush3.msra.mxu0 %v233_v18  ;;  %2409 = vmatpush3.msra.mxu1 %v233_v18 }
 0x110   :  { %v2382_v21 = vpop.f32.mrf.mxu0  ;;  %2386 = vmatmul.mubr.f32.vlgmr.msra.gmra.mxu0 %v2801_v17  ;;  %2388 = vmatprep.subr.mxu0 %v2712_v0 }
 0x111   :  { %v311_v22 = vand.u32 4294901760, %v310_v20  ;;  %2390 = vmatprep.mubr.msk.f32.mxu0 %vm2713_vm0, %v2712_v0  ;;  %2411 = vmatmul.mubr.msk.f32.vlgmr.msra.gmra.mxu1 %vm198_vm2, %v2715_v23 }
 0x112   :  { %2418 = vmatprep.subr.mxu1 %v2712_v0  ;;  %2420 = vmatprep.mubr.msk.f32.mxu1 %vm2713_vm0, %v2712_v0 }
 0x113   :  { %v312_v24 = vsub.f32 %v310_v20, %v311_v22 }
 0x115   :  { %v313_v25 = vand.u32 4294901760, %v312_v24  ;;  %v1112_v24 = vsub.s32 1, %v2830_v40 }
 0x117   :  { %2389 = vmatpush3.msra.mxu0 %v313_v25 }
 0x118   :  { %2391 = vmatmul.mubr.msk.f32.vlgmr.msra.gmra.mxu0 %vm198_vm2, %v2715_v23  ;;  %2393 = vmatprep.subr.mxu0 %v2712_v0 }
 0x119   :  { %2394 = vmatpush3.msra.mxu0 %v310_v20  ;;  %2395 = vmatprep.mubr.msk.f32.mxu0 %vm2713_vm0, %v2712_v0 }
 0x11a   :  { %2398 = vmatprep.subr.mxu0 %v2712_v0 }
 0x11c   :  { %2396 = vmatmul.mubr.f32.vlgmr.msra.gmra.mxu0 %v2794_v7 }
 0x11d   :  { %2399 = vmatpush3.msra.mxu0 %v233_v18  ;;  %2400 = vmatprep.mubr.msk.f32.mxu0 %vm2713_vm0, %v2712_v0 }
 0x11e   :  { %2403 = vmatprep.subr.mxu0 %v2712_v0 }
 0x120   :  { %2401 = vmatmul.mubr.f32.vlgmr.msra.gmra.mxu0 %v2797_v10 }
 0x121   :  { %2404 = vmatpush3.msra.mxu0 %v311_v22  ;;  %2405 = vmatprep.mubr.msk.f32.mxu0 %vm2713_vm0, %v2712_v0  ;;  %v2878_v22 = vld [vmem:[%s2966_s5] sm:$0xf] }
 0x122   :  { %2413 = vmatprep.subr.mxu0 %v2712_v0 }
 0x124   :  { %2406 = vmatmul.mubr.msk.f32.vlgmr.msra.gmra.mxu0 %vm198_vm2, %v2715_v23 }
 0x125   :  { %2415 = vmatprep.mubr.msk.f32.mxu0 %vm2713_vm0, %v2712_v0 }
 0x1d0   :  { %v274_v26 = vpop.f32.mrf.mxu0 }
 0x1d1   :  { %v644_v27 = vpop.f32.mrf.mxu1 }
 0x1d2   :  { %v2387_v28 = vpop.f32.mrf.mxu0 }
 0x1d3   :  { %v2412_v29 = vpop.f32.mrf.mxu1  ;;  %v1113_v28 = vrot.slane %v2878_v22, %v1112_v24 }
 0x1d8   :  { %v350_v30 = vpop.f32.mrf.mxu0 }
 0x1d9   :  { %v351_v34 = vadd.f32 %v350_v30, %v274_v26 }
 0x1da   :  { %v2392_v31 = vpop.f32.mrf.mxu0 }
 0x1dc   :  { %v424_v32 = vpop.f32.mrf.mxu0 }
 0x1dd   :  { %v425_v37 = vadd.f32 %v424_v32, %v351_v34 }
 0x1de   :  { %v2397_v33 = vpop.f32.mrf.mxu0 }
 0x1e0   :  { %v498_v36 = vpop.f32.mrf.mxu0 }
 0x1e1   :  { %v499_v39 = vadd.f32 %v498_v36, %v425_v37 }
 0x1e2   :  { %v2402_v38 = vpop.f32.mrf.mxu0 }
 0x1e4   :  { %v572_v41 = vpop.f32.mrf.mxu0 }
 0x1e5   :  { %v573_v42 = vadd.f32 %v572_v41, %v499_v39 }
 0x1e6   :  { %v2407_v43 = vpop.f32.mrf.mxu0 }
 0x1e7   :  { %v645_v44 = vadd.f32 %v644_v27, %v573_v42 }
 0x1e9   :  { %v648_v46 = vmul.f32 0.125, %v645_v44 }
 0x1eb   :  { %v652_v47 = vrot.slane %v648_v46, %v2833_v45 }
 0x1ed   :  { %v2836_v48 = vsub.f32 %v193_v15, %v652_v47 }
 0x1ef   :  { %v654_v49 = vmul.f32 %v2836_v48, %v2836_v48 }
 0x1f1   :  { %v686_v50 = vand.u32 4294901760, %v654_v49 }
 0x1f3   :  { %2414 = vmatpush3.msra.mxu0 %v686_v50  ;;  %v763_v51 = vsub.f32 %v654_v49, %v686_v50 }
 0x1f4   :  { %2416 = vmatmul.mubr.f32.vlgmr.msra.gmra.mxu0 %v2801_v17  ;;  %2423 = vmatprep.subr.mxu0 %v2712_v0 }
 0x1f5   :  { %2424 = vmatpush3.msra.mxu0 %v763_v51  ;;  %2425 = vmatprep.mubr.msk.f32.mxu0 %vm2713_vm0, %v2712_v0  ;;  %v764_v52 = vand.u32 4294901760, %v763_v51 }
 0x1f6   :  { %2433 = vmatprep.subr.mxu0 %v2712_v0 }
 0x1f7   :  { %v765_v53 = vsub.f32 %v763_v51, %v764_v52 }
 0x1f8   :  { %2426 = vmatmul.mubr.f32.vlgmr.msra.gmra.mxu0 %v2794_v7 }
 0x1f9   :  { %2434 = vmatpush3.msra.mxu0 %v764_v52  ;;  %v766_v54 = vand.u32 4294901760, %v765_v53  ;;  %2435 = vmatprep.mubr.msk.f32.mxu0 %vm2713_vm0, %v2712_v0 }
 0x1fa   :  { %2443 = vmatprep.subr.bf16.mxu0 %v2712_v0 }
 0x1fb   :  { %2419 = vmatpush3.msra.mxu1 %v766_v54 }
 0x1fc   :  { %2421 = vmatmul.mubr.msk.f32.vlgmr.msra.gmra.mxu1 %vm198_vm2, %v2715_v23  ;;  %2428 = vmatprep.subr.mxu1 %v2712_v0 }
 0x1fd   :  { %2429 = vmatpush3.msra.mxu1 %v686_v50  ;;  %2430 = vmatprep.mubr.msk.f32.mxu1 %vm2713_vm0, %v2712_v0 }
 0x1fe   :  { %2438 = vmatprep.subr.mxu1 %v2712_v0  ;;  %2436 = vmatmul.mubr.msk.f32.vlgmr.msra.gmra.mxu0 %vm198_vm2, %v2715_v23 }
 0x1ff   :  { %2459 = vmatprep.mubr.msk.bf16.mxu0 %vm2713_vm0, %v2712_v0  ;;  %2444 = vmatpush3.bf16.msra.mxu0 %v2557_v55 }
 0x200   :  { %2431 = vmatmul.mubr.f32.vlgmr.msra.gmra.mxu1 %v2797_v10  ;;  %2445 = vmatprep.subr.bf16.mxu0 %v2712_v0 }
 0x201   :  { %2439 = vmatpush3.msra.mxu1 %v686_v50  ;;  %2440 = vmatprep.mubr.msk.f32.mxu1 %vm2713_vm0, %v2712_v0 }
 0x202   :  { %2463 = vmatprep.subr.mxu1 %v2712_v0 }
 0x203   :  { %2446 = vmatpush3.bf16.msra.mxu0 %v2558_v56 }
 0x204   :  { %2441 = vmatmul.mubr.msk.f32.vlgmr.msra.gmra.mxu1 %vm198_vm2, %v2715_v23  ;;  %2447 = vmatprep.subr.bf16.mxu0 %v2712_v0 }
 0x205   :  { %2465 = vmatprep.mubr.msk.f32.mxu1 %vm2713_vm0, %v2712_v0 }
 0x207   :  { %2448 = vmatpush3.bf16.msra.mxu0 %v2559_v57 }
 0x208   :  { %2449 = vmatprep.subr.bf16.mxu0 %v2712_v0 }
 0x20b   :  { %2450 = vmatpush3.bf16.msra.mxu0 %v2560_v58 }
 0x20c   :  { %2451 = vmatprep.subr.bf16.mxu0 %v2712_v0 }
 0x20f   :  { %2452 = vmatpush3.bf16.msra.mxu0 %v2561_v59 }
 0x210   :  { %2453 = vmatprep.subr.bf16.mxu0 %v2712_v0 }
 0x213   :  { %2454 = vmatpush3.bf16.msra.mxu0 %v2562_v60 }
 0x214   :  { %2455 = vmatprep.subr.bf16.mxu0 %v2712_v0 }
 0x217   :  { %2456 = vmatpush3.bf16.msra.mxu0 %v2563_v61 }
 0x218   :  { %2457 = vmatprep.subr.bf16.mxu0 %v2712_v0 }
 0x21b   :  { %2458 = vmatpush3.bf16.msra.mxu0 %v2564_v62 }
 0x21c   :  { %2508 = vmatprep.subr.mxu0 %v2712_v0 }
 0x2b4   :  { %v727_v63 = vpop.f32.mrf.mxu0 }
 0x2b6   :  { %v2417_v1 = vpop.f32.mrf.mxu0 }
 0x2b8   :  { %v877_v2 = vpop.f32.mrf.mxu0 }
 0x2ba   :  { %v2427_v3 = vpop.f32.mrf.mxu0 }
 0x2bc   :  { %v803_v4 = vpop.f32.mrf.mxu1 }
 0x2bd   :  { %v804_v5 = vadd.f32 %v803_v4, %v727_v63 }
 0x2be   :  { %v2422_v6 = vpop.f32.mrf.mxu1  ;;  %v1025_v8 = vpop.f32.mrf.mxu0 }
 0x2bf   :  { %v878_v9 = vadd.f32 %v877_v2, %v804_v5  ;;  %v2568_v6 = vld [vmem:[#allocation10 + $0x20] sm:$0xff]  }
 0x2c0   :  { %v951_v11 = vpop.f32.mrf.mxu1  ;;  %v2437_v12 = vpop.f32.mrf.mxu0 }
 0x2c1   :  { %v952_v13 = vadd.f32 %v951_v11, %v878_v9  ;;  %v2571_v9 = vld [vmem:[#allocation10 + $0x8] sm:$0xff]   ;;  %v2572_v11 = vld [vmem:[#allocation10] sm:$0xff]  }
 0x2c2   :  { %v2432_v14 = vpop.f32.mrf.mxu1 }
 0x2c3   :  { %v1026_v15 = vadd.f32 %v1025_v8, %v952_v13  ;;  %v2570_v8 = vld [vmem:[#allocation10 + $0x10] sm:$0xff]  }
 0x2c4   :  { %v1097_v16 = vpop.f32.mrf.mxu1 }
 0x2c5   :  { %v1098_v18 = vadd.f32 %v1097_v16, %v1026_v15 }
 0x2c6   :  { %v2442_v19 = vpop.f32.mrf.mxu1 }
 0x2c7   :  { %v1101_v20 = vmul.f32 0.125, %v1098_v18 }
 0x2c9   :  { %v1102_v21 = vadd.f32 1e-05, %v1101_v20 }
 0x2cb   :  { %2573 = vrsqrt.f32 %v1102_v21 }
 0x2d8   :  { %v2574_v25 = vpop.eup %2573 }
 0x2d9   :  { %v1104_v26 = vmul.f32 %v2574_v25, %v2878_v22 }
 0x2db   :  { %v1108_v27 = vrot.slane %v1104_v26, %v2833_v45 }
 0x2dd   :  { %v1109_v29 = vmul.f32 %v1108_v27, %v2836_v48 }
 0x2df   :  { %v1114_v30 = vadd.f32 %v1113_v28, %v1109_v29 }
 0x2e1   :  { %v1115_v31 = vmax.f32 %v1114_v30, 0.0 }
 0x2e3   :  { %v1116_v32 = vpack.c.bf16 %v1115_v31, %v1115_v31 }
 0x2e5   :  { %2460 = vmatmul.mubr.bf16.vlgmr.msra.gmra.mxu0 %v1116_v32 }
 0x2e6   :  { %2510 = vmatprep.mubr.msk.f32.mxu0 %vm2713_vm0, %v2712_v0 }
 0x3a5   :  { %v1215_v33 = vpop.f32.mrf.mxu0 }
 0x3a6   :  { %v1252_v34 = vand.u32 4294901760, %v1215_v33 }
 0x3a7   :  { %v2461_v35 = vpop.f32.mrf.mxu0 }
 0x3a8   :  { %v1329_v36 = vsub.f32 %v1215_v33, %v1252_v34  ;;  %2464 = vmatpush3.msra.mxu1 %v1252_v34  ;;  %v2129_v35 = vsub.s32 2, %v2830_v40 }
 0x3a9   :  { %v1218_v37 = vpop.f32.mrf.mxu0  ;;  %2466 = vmatmul.mubr.f32.vlgmr.msra.gmra.mxu1 %v2801_v17  ;;  %2468 = vmatprep.subr.mxu1 %v2712_v0 }
 0x3aa   :  { %v1330_v38 = vand.u32 4294901760, %v1329_v36  ;;  %2470 = vmatprep.mubr.msk.f32.mxu1 %vm2713_vm0, %v2712_v0 }
 0x3ab   :  { %v2462_v39 = vpop.f32.mrf.mxu0 }
 0x3ac   :  { %v1331_v41 = vsub.f32 %v1329_v36, %v1330_v38 }
 0x3ae   :  { %v1332_v42 = vand.u32 4294901760, %v1331_v41 }
 0x3b0   :  { %2469 = vmatpush3.msra.mxu1 %v1332_v42 }
 0x3b1   :  { %2471 = vmatmul.mubr.msk.f32.vlgmr.msra.gmra.mxu1 %vm198_vm2, %v2715_v23  ;;  %2473 = vmatprep.subr.mxu1 %v2712_v0 }
 0x3b2   :  { %2474 = vmatpush3.msra.mxu1 %v1329_v36  ;;  %2475 = vmatprep.mubr.msk.f32.mxu1 %vm2713_vm0, %v2712_v0  ;;  %v2134_v36 = vsub.s32 3, %v2830_v40 }
 0x3b3   :  { %2478 = vmatprep.subr.mxu1 %v2712_v0 }
 0x3b4   :  { %v2135_v39 = vrot.slane %v2878_v22, %v2134_v36 }
 0x3b5   :  { %2476 = vmatmul.mubr.f32.vlgmr.msra.gmra.mxu1 %v2794_v7 }
 0x3b6   :  { %2479 = vmatpush3.msra.mxu1 %v1252_v34  ;;  %2480 = vmatprep.mubr.msk.f32.mxu1 %vm2713_vm0, %v2712_v0 }
 0x3b7   :  { %2483 = vmatprep.subr.mxu1 %v2712_v0 }
 0x3b9   :  { %2481 = vmatmul.mubr.f32.vlgmr.msra.gmra.mxu1 %v2797_v10 }
 0x3ba   :  { %2484 = vmatpush3.msra.mxu1 %v1330_v38  ;;  %2485 = vmatprep.mubr.msk.f32.mxu1 %vm2713_vm0, %v2712_v0 }
 0x3bb   :  { %2488 = vmatprep.subr.mxu1 %v2712_v0 }
 0x3bd   :  { %2486 = vmatmul.mubr.msk.f32.vlgmr.msra.gmra.mxu1 %vm198_vm2, %v2715_v23 }
 0x3be   :  { %2489 = vmatpush3.msra.mxu1 %v1252_v34  ;;  %2490 = vmatprep.mubr.msk.f32.mxu1 %vm2713_vm0, %v2712_v0 }
 0x3bf   :  { %2493 = vmatprep.subr.mxu1 %v2712_v0 }
 0x3c1   :  { %2491 = vmatmul.mubr.msk.f32.vlgmr.msra.gmra.mxu1 %vm198_vm2, %v2715_v23 }
 0x3c2   :  { %2495 = vmatprep.mubr.msk.f32.mxu1 %vm2713_vm0, %v2712_v0 }
 0x469   :  { %v1293_v43 = vpop.f32.mrf.mxu1 }
 0x46b   :  { %v2467_v44 = vpop.f32.mrf.mxu1 }
 0x471   :  { %v1369_v46 = vpop.f32.mrf.mxu1 }
 0x472   :  { %v1370_v51 = vadd.f32 %v1369_v46, %v1293_v43  ;;  %v2292_v46 = vld [vmem:[%s2967_s6] ss:$0 sm:$0xff] }
 0x473   :  { %v2472_v47 = vpop.f32.mrf.mxu1 }
 0x475   :  { %v1443_v48 = vpop.f32.mrf.mxu1 }
 0x476   :  { %v1444_v53 = vadd.f32 %v1443_v48, %v1370_v51 }
 0x477   :  { %v2477_v49 = vpop.f32.mrf.mxu1 }
 0x479   :  { %v1517_v50 = vpop.f32.mrf.mxu1 }
 0x47a   :  { %v1518_v55 = vadd.f32 %v1517_v50, %v1444_v53 }
 0x47b   :  { %v2482_v52 = vpop.f32.mrf.mxu1 }
 0x47d   :  { %v1591_v54 = vpop.f32.mrf.mxu1 }
 0x47e   :  { %v1592_v57 = vadd.f32 %v1591_v54, %v1518_v55 }
 0x47f   :  { %v2487_v56 = vpop.f32.mrf.mxu1 }
 0x481   :  { %v1663_v58 = vpop.f32.mrf.mxu1 }
 0x482   :  { %v1664_v59 = vadd.f32 %v1663_v58, %v1592_v57 }
 0x483   :  { %v2492_v60 = vpop.f32.mrf.mxu1 }
 0x484   :  { %v1667_v61 = vmul.f32 0.125, %v1664_v59 }
 0x486   :  { %v1671_v62 = vrot.slane %v1667_v61, %v2833_v45 }
 0x488   :  { %v2915_v63 = vsub.f32 %v1215_v33, %v1671_v62 }
 0x48a   :  { %v1673_v1 = vmul.f32 %v2915_v63, %v2915_v63 }
 0x48c   :  { %v1705_v2 = vand.u32 4294901760, %v1673_v1 }
 0x48e   :  { %2494 = vmatpush3.msra.mxu1 %v1705_v2  ;;  %2509 = vmatpush3.msra.mxu0 %v1705_v2  ;;  %v1782_v3 = vsub.f32 %v1673_v1, %v1705_v2 }
 0x48f   :  { %2518 = vmatprep.subr.mxu0 %v2712_v0  ;;  %2511 = vmatmul.mubr.f32.vlgmr.msra.gmra.mxu0 %v2797_v10  ;;  %v2565_v10 = vld [vmem:[#allocation10 + $0x38] sm:$0xff]  }
 0x490   :  { %2519 = vmatpush3.msra.mxu0 %v1705_v2  ;;  %2496 = vmatmul.mubr.f32.vlgmr.msra.gmra.mxu1 %v2801_v17  ;;  %v1783_v4 = vand.u32 4294901760, %v1782_v3  ;;  %v2566_v17 = vld [vmem:[#allocation10 + $0x30] sm:$0xff]  }
 0x491   :  { %2498 = vmatprep.subr.mxu1 %v2712_v0  ;;  %2500 = vmatprep.mubr.msk.f32.mxu1 %vm2713_vm0, %v2712_v0 }
 0x492   :  { %v1784_v45 = vsub.f32 %v1782_v3, %v1783_v4  ;;  %2520 = vmatprep.mubr.msk.f32.mxu0 %vm2713_vm0, %v2712_v0 }
 0x493   :  { %2521 = vmatmul.mubr.msk.f32.vlgmr.msra.gmra.mxu0 %vm198_vm2, %v2715_v23 }
 0x494   :  { %v1785_v5 = vand.u32 4294901760, %v1784_v45 }
 0x496   :  { %2499 = vmatpush3.msra.mxu1 %v1785_v5 }
 0x497   :  { %2501 = vmatmul.mubr.msk.f32.vlgmr.msra.gmra.mxu1 %vm198_vm2, %v2715_v23  ;;  %2503 = vmatprep.subr.mxu1 %v2712_v0 }
 0x498   :  { %2504 = vmatpush3.msra.mxu1 %v1782_v3  ;;  %2505 = vmatprep.mubr.msk.f32.mxu1 %vm2713_vm0, %v2712_v0 }
 0x499   :  { %2513 = vmatprep.subr.mxu1 %v2712_v0 }
 0x49b   :  { %2506 = vmatmul.mubr.f32.vlgmr.msra.gmra.mxu1 %v2794_v7  ;;  %v2567_v7 = vld [vmem:[#allocation10 + $0x28] sm:$0xff]  }
 0x49c   :  { %2514 = vmatpush3.msra.mxu1 %v1783_v4  ;;  %2515 = vmatprep.mubr.msk.f32.mxu1 %vm2713_vm0, %v2712_v0 }
 0x49d   :  { %2523 = vmatprep.subr.bf16.mxu1 %v2712_v0 }
 0x49f   :  { %2516 = vmatmul.mubr.msk.f32.vlgmr.msra.gmra.mxu1 %vm198_vm2, %v2715_v23  ;;  %v2569_v23 = vld [vmem:[#allocation10 + $0x18] sm:$0xff]  }
 0x4a0   :  { %2539 = vmatprep.mubr.msk.bf16.mxu1 %vm2713_vm0, %v2712_v0  ;;  %2524 = vmatpush3.bf16.msra.mxu1 %v2565_v10 }
 0x4a1   :  { %2525 = vmatprep.subr.bf16.mxu1 %v2712_v0 }
 0x4a4   :  { %2526 = vmatpush3.bf16.msra.mxu1 %v2566_v17 }
 0x4a5   :  { %2527 = vmatprep.subr.bf16.mxu1 %v2712_v0 }
 0x4a8   :  { %2528 = vmatpush3.bf16.msra.mxu1 %v2567_v7 }
 0x4a9   :  { %2529 = vmatprep.subr.bf16.mxu1 %v2712_v0 }
 0x4ac   :  { %2530 = vmatpush3.bf16.msra.mxu1 %v2568_v6 }
 0x4ad   :  { %2531 = vmatprep.subr.bf16.mxu1 %v2712_v0 }
 0x4b0   :  { %2532 = vmatpush3.bf16.msra.mxu1 %v2569_v23 }
 0x4b1   :  { %2533 = vmatprep.subr.bf16.mxu1 %v2712_v0 }
 0x4b4   :  { %2534 = vmatpush3.bf16.msra.mxu1 %v2570_v8 }
 0x4b5   :  { %2535 = vmatprep.subr.bf16.mxu1 %v2712_v0 }
 0x4b8   :  { %2536 = vmatpush3.bf16.msra.mxu1 %v2571_v9 }
 0x4b9   :  { %2537 = vmatprep.subr.bf16.mxu1 %v2712_v0 }
 0x4bc   :  { %2538 = vmatpush3.bf16.msra.mxu1 %v2572_v11 }
 0x54f   :  { %v1970_v12 = vpop.f32.mrf.mxu0 }
 0x550   :  { %v1746_v13 = vpop.f32.mrf.mxu1 }
 0x551   :  { %v2512_v14 = vpop.f32.mrf.mxu0 }
 0x552   :  { %v2497_v15 = vpop.f32.mrf.mxu1 }
 0x553   :  { %v2116_v16 = vpop.f32.mrf.mxu0 }
 0x555   :  { %v2522_v18 = vpop.f32.mrf.mxu0 }
 0x557   :  { %v1822_v19 = vpop.f32.mrf.mxu1 }
 0x558   :  { %v1823_v21 = vadd.f32 %v1822_v19, %v1746_v13 }
 0x559   :  { %v2502_v20 = vpop.f32.mrf.mxu1 }
 0x55b   :  { %v1896_v24 = vpop.f32.mrf.mxu1 }
 0x55c   :  { %v1897_v25 = vadd.f32 %v1896_v24, %v1823_v21 }
 0x55d   :  { %v2507_v26 = vpop.f32.mrf.mxu1 }
 0x55e   :  { %v1971_v27 = vadd.f32 %v1970_v12, %v1897_v25 }
 0x55f   :  { %v2044_v28 = vpop.f32.mrf.mxu1 }
 0x560   :  { %v2045_v29 = vadd.f32 %v2044_v28, %v1971_v27 }
 0x561   :  { %v2517_v30 = vpop.f32.mrf.mxu1 }
 0x562   :  { %v2117_v31 = vadd.f32 %v2116_v16, %v2045_v29 }
 0x564   :  { %v2120_v32 = vmul.f32 0.125, %v2117_v31 }
 0x566   :  { %v2121_v0 = vadd.f32 1e-05, %v2120_v32 }
 0x568   :  { %2575 = vrsqrt.f32 %v2121_v0 }
 0x575   :  { %v2576_v33 = vpop.eup %2575 }
 0x576   :  { %v2124_v34 = vrot.slane %v2576_v33, 6 }
 0x578   :  { %v2126_v37 = vmul.f32 %v2124_v34, %v2878_v22 }
 0x57a   :  { %v2130_v38 = vrot.slane %v2126_v37, %v2129_v35 }
 0x57c   :  { %v2131_v41 = vmul.f32 %v2130_v38, %v2915_v63 }
 0x57e   :  { %v2136_v42 = vadd.f32 %v2135_v39, %v2131_v41 }
 0x580   :  { %v2137_v43 = vmax.f32 %v2136_v42, 0.0 }
 0x582   :  { %v2138_v44 = vpack.c.bf16 %v2137_v43, %v2137_v43 }
 0x584   :  { %2540 = vmatmul.mubr.bf16.vlgmr.msra.gmra.mxu1 %v2138_v44 }
 0x644   :  { %v2244_v47 = vpop.f32.mrf.mxu1 }
 0x645   :  { %v2245_v48 = vadd.f32 %v2292_v46, %v2244_v47 }
 0x646   :  { %v2541_v40 = vpop.f32.mrf.mxu1 }
 0x647   :  { %2250 = vst [vmem:[#allocation11] sm:$0xff] %v2245_v48 }
 0x648   :  { %v2247_v49 = vpop.f32.mrf.mxu1 }
 0x649   :  { %2688 = shalt.err (!%p2685_p1)
}
 0x64a   :  { %2260 = dma.vmem_to_hbm [thread:$0]  %s2258_s27, 128, %s2968_s7, [#allocation4]   ;;  %v2542_v22 = vpop.f32.mrf.mxu1 }
 0x64b   :  { %2703 = dma.done.wait [#allocation4], 128  }
 0x64c   :  { %2704 = vsyncadd [#allocation4], 4294967168 }
 0x64d   :  { %2264 = vsyncpa [#allocation3], 1 }
 0x64e   :  { %2265 = vsyncpa [#allocation6], 1 }
 0x64f   :  { %2266 = vsyncpa [#allocation9], 1 }
 0x650   :  { %2267 = vsyncpa [#allocation4], 1 }

</bundles_post_ra>
